<compile_context>
chip_gen: v7x
topology: tpu7x:2x2x1
jax: 0.10.0
libtpu: 0.0.40
codegen_flags: <defaults>
</compile_context>

<pallas_src>
import numpy as np
import jax
import jax.numpy as jnp
from jax.experimental import pallas as pl
from jax.experimental.pallas import tpu as pltpu

KERNEL_SIZE = 3


# ----------------------------- helpers -----------------------------

def _round_up(x, m):
    return ((x + m - 1) // m) * m


def _pick_lane_tile(f_pad, max_tile=512):
    """Largest multiple-of-128 tile <= max_tile that divides f_pad (f_pad % 128 == 0)."""
    t = min(f_pad, max_tile)
    while f_pad % t:
        t -= 128
    return t


# ----------------------------- Pallas kernel -----------------------------

def _freq_mix_kernel(wr_ref, wi_ref, xr_ref, xi_ref, zr_ref, zi_ref):
    """Complex channel mixing for one lane-tile of frequencies, all batch elements.

    wr/wi : (C_in, C_out, tF)  planar weight tiles (frequencies lane-dense)
    xr/xi : (B, C_in, tF)      channels on sublanes, frequencies lane-dense
    zr/zi : (B, C_out, tF)
    """
    c_in = wr_ref.shape[0]
    xr = xr_ref[...]                                   # (B, C_in, tF)
    xi = xi_ref[...]
    accr = jnp.zeros(zr_ref.shape, dtype=jnp.float32)  # (B, C_out, tF)
    acci = jnp.zeros(zi_ref.shape, dtype=jnp.float32)
    # C_in is small (=width=8) -> static unroll keeps everything in vregs.
    # TODO(synk): switch to lax.fori_loop(..., unroll=True) / chunked unroll and
    # stride-0 sublane-broadcast loads once C_in grows past ~16.
    for ci in range(c_in):
        wr_ci = wr_ref[ci][None]        # (1, C_out, tF)  contiguous weight slab
        wi_ci = wi_ref[ci][None]
        xr_ci = xr[:, ci:ci + 1, :]     # (B, 1, tF) -> sublane broadcast
        xi_ci = xi[:, ci:ci + 1, :]
        accr = accr + wr_ci * xr_ci - wi_ci * xi_ci
        acci = acci + wr_ci * xi_ci + wi_ci * xr_ci
    zr_ref[...] = accr
    zi_ref[...] = acci


def freq_channel_mix(wr, wi, xr, xi):
    """zfft[b,o,f] = sum_i (wr + i*wi)[i,o,f] * (xr + i*xi)[b,i,f].

    wr/wi: (C_in, C_out, F_pad) f32; xr/xi: (B, C_in, F_pad) f32; F_pad % 128 == 0.
    Returns zr, zi: (B, C_out, F_pad) f32.
    """
    c_in, c_out, f_pad = wr.shape
    b = xr.shape[0]
    assert f_pad % 128 == 0
    tf = _pick_lane_tile(f_pad)
    grid = (f_pad // tf,)

    w_spec = pl.BlockSpec((c_in, c_out, tf), lambda f: (0, 0, f))
    x_spec = pl.BlockSpec((b, c_in, tf), lambda f: (0, 0, f))
    z_spec = pl.BlockSpec((b, c_out, tf), lambda f: (0, 0, f))

    zr, zi = pl.pallas_call(
        _freq_mix_kernel,
        out_shape=(jax.ShapeDtypeStruct((b, c_out, f_pad), jnp.float32),
                   jax.ShapeDtypeStruct((b, c_out, f_pad), jnp.float32)),
        grid=grid,
        in_specs=[w_spec, w_spec, x_spec, x_spec],
        out_specs=(z_spec, z_spec),
        compiler_params=pltpu.CompilerParams(
            dimension_semantics=("parallel",),
            vmem_limit_bytes=64 * 1024 * 1024),
    )(wr, wi, xr, xi)
    return zr, zi


# ------------------- plain-JAX glue (FFTs, BRO weight prep) -------------------

def fft_shift_matrix(n, shift_amount):
    shift = np.arange(n)[None, :] + np.arange(n)[:, None]
    return np.exp(1j * 2.0 * np.pi * shift_amount * shift / n)


def complex_solve(A, B):
    """Solve A X = B for complex A, B via the equivalent real block system."""
    r = A.shape[-1]
    Ar, Ai = jnp.real(A), jnp.imag(A)
    Br, Bi = jnp.real(B), jnp.imag(B)
    Areal = jnp.concatenate(
        [jnp.concatenate([Ar, -Ai], axis=-1),
         jnp.concatenate([Ai, Ar], axis=-1)], axis=-2)
    Breal = jnp.concatenate([Br, Bi], axis=-2)
    X = jnp.linalg.solve(Areal, Breal)
    return jax.lax.complex(X[..., :r, :], X[..., r:, :])


def bro(VFFT, width, rank):
    VH = jnp.conj(jnp.swapaxes(VFFT, -1, -2))
    VTV = VH @ VFFT
    eps = jnp.mean(jnp.diagonal(VTV, axis1=-2, axis2=-1), axis=-1) * 1e-7
    VTV = VTV + eps[..., None, None] * jnp.eye(rank, dtype=VTV.dtype)
    sol = complex_solve(VTV, VH)
    I_full = jnp.eye(width, dtype=VFFT.dtype)
    return I_full - 2.0 * (VFFT @ sol)


def process_vfft_complex(V_i, n, width, rank):
    """BRO-orthogonalized frequency-domain weight, (F, C_out, C_in) complex64."""
    shift_amount = (KERNEL_SIZE - 1) // 2
    sm = jnp.asarray(fft_shift_matrix(n, -shift_amount)[:, : n // 2 + 1],
                     dtype=jnp.complex64)
    VFFT = sm * jnp.conj(jnp.fft.rfft2(V_i, s=(n, n), norm="ortho"))
    VFFT = jnp.transpose(VFFT, (2, 3, 0, 1))          # (n, n//2+1, width, rank)
    WFFT = bro(VFFT, width, rank)
    return WFFT.reshape(n * (n // 2 + 1), width, width)


def process_vfft_planar(V_i, n, width, rank):
    """Planar (C_in, C_out, F_pad) real/imag weight planes, lane-padded to 128.

    Layout + padding are produced once here on the weight side, so no per-layer
    transpose/deinterleave sits between the BRO solve and the Pallas call.
    """
    WFFT = process_vfft_complex(V_i, n, width, rank)   # (F, C_out, C_in)
    F = WFFT.shape[0]
    w_t = jnp.transpose(WFFT, (2, 1, 0))               # (C_in, C_out, F)
    # Keep f32 weights: BRO orthogonality is sensitive to weight precision
    # (bf16 would risk the 1e-3 tolerance vs. the f32 reference).
    wr = jnp.real(w_t).astype(jnp.float32)
    wi = jnp.imag(w_t).astype(jnp.float32)
    f_pad = _round_up(F, 128)
    if f_pad > F:
        pad = ((0, 0), (0, 0), (0, f_pad - F))
        wr = jnp.pad(wr, pad)
        wi = jnp.pad(wi, pad)
    return wr, wi


def frequency_convolution(x, wr, wi, n, width):
    pad = KERNEL_SIZE // 2
    xp = jnp.pad(x, ((0, 0), (0, 0), (pad, pad), (pad, pad)))  # zero_padding=True
    B = xp.shape[0]
    nh = n // 2 + 1
    F = n * nh
    f_pad = wr.shape[-1]
    xfft = jnp.fft.rfft2(xp, norm="ortho")                     # (B, C, n, nh)
    # re/im split + reshape + lane pad fuse into one XLA pass over xfft.
    # TODO(synk): a bitcast-interleaved re/im layout consumed directly by the
    # kernel could drop this pass entirely.
    xr = jnp.real(xfft).reshape(B, width, F).astype(jnp.float32)
    xi = jnp.imag(xfft).reshape(B, width, F).astype(jnp.float32)
    if f_pad > F:
        padw = ((0, 0), (0, 0), (0, f_pad - F))
        xr = jnp.pad(xr, padw)
        xi = jnp.pad(xi, padw)

    zr, zi = freq_channel_mix(wr, wi, xr, xi)                  # Pallas hot path

    # Per-channel mean of irfft2(zfft) over (B, H, W): with norm='ortho' and the
    # row-major (n, n//2+1) reshape, flat frequency index 0 IS the (0,0) DC bin
    # and mean_{h,w} z = Re(Z[0,0]) / n, so the mean is a free byproduct here.
    mean = jnp.mean(zr[:, :, 0], axis=0) / n
    zfft = jax.lax.complex(zr[:, :, :F], zi[:, :, :F]).reshape(B, width, n, nh)
    z = jnp.fft.irfft2(zfft, norm="ortho")
    return z, mean


def ortho_conv_v2_forward(x, params):
    weights = params["weights"]              # (depth, width, rank, 3, 3)
    gamma = params["gamma"]                  # (depth, width, 1, 1, 1)
    bias = params["bias"]                    # (depth, width)
    identity = params["identity"]            # (width, rank, 3, 3)
    running_mean = params["running_mean"]    # (depth, width)
    padding_sizes = params["padding_input_sizes"]
    scale = params["scale"]
    depth, width, rank = weights.shape[0], weights.shape[1], weights.shape[2]

    V = identity[None] + weights * gamma * scale     # quasi_residual=True

    all_means = []
    for i in range(depth):
        n = padding_sizes[i]
        wr, wi = process_vfft_planar(V[i], n, width, rank)   # BRO weight prep
        z, mean = frequency_convolution(x, wr, wi, n, width) # circular conv via FFT
        # bias + mean subtraction + ReLU in plain jnp: XLA fuses this into the
        # irfft2 epilogue (a separate Pallas launch here was pure overhead).
        x = jnp.maximum(z + (bias[i] - mean)[None, :, None, None], 0.0)
        all_means.append(mean)
    all_means = jnp.stack(all_means)
    new_running_mean = running_mean + (all_means - running_mean) * 0.1
    return x, new_running_mean


# -------------------- plain-JAX f32 reference (for sanity) --------------------

def ortho_conv_v2_forward_ref(x, params):
    weights = params["weights"]; gamma = params["gamma"]; bias = params["bias"]
    identity = params["identity"]; running_mean = params["running_mean"]
    padding_sizes = params["padding_input_sizes"]; scale = params["scale"]
    depth, width = weights.shape[0], weights.shape[1]
    rank = weights.shape[2]
    V = identity[None] + weights * gamma * scale
    pad = KERNEL_SIZE // 2
    all_means = []
    for i in range(depth):
        n = padding_sizes[i]
        wfft = process_vfft_complex(V[i], n, width, rank)
        xp = jnp.pad(x, ((0, 0), (0, 0), (pad, pad), (pad, pad)))
        B = xp.shape[0]
        nh = n // 2 + 1
        xfft = jnp.fft.rfft2(xp, norm="ortho").reshape(B, width, n * nh)
        zfft = jnp.einsum("foi,bif->bof", wfft, xfft)
        z = jnp.fft.irfft2(zfft.reshape(B, width, n, nh), norm="ortho")
        mean = jnp.mean(z, axis=(0, 2, 3))
        all_means.append(mean)
        x = jnp.maximum(z + (bias[i] - mean)[None, :, None, None], 0.0)
    all_means = jnp.stack(all_means)
    return x, running_mean + (all_means - running_mean) * 0.1


# ----------------------------------- main -----------------------------------

if __name__ == "__main__":
    depth, width, input_size, batch = 2, 8, 8, 2
    weight_rank_ratio = 0.5
    rank = int(width * weight_rank_ratio)        # 'bro' weight_rank_mapping -> 4
    scale = depth ** (-0.5)

    key = jax.random.PRNGKey(0)
    k_w, k_x = jax.random.split(key)

    # Deterministic parameter init (mirrors __init__ shapes / scaling).
    weights = jax.random.normal(
        k_w, (depth, width, rank, KERNEL_SIZE, KERNEL_SIZE),
        dtype=jnp.float32) / (width * KERNEL_SIZE ** 2)
    identity = jnp.zeros((width, rank, KERNEL_SIZE, KERNEL_SIZE), jnp.float32)
    identity = identity.at[:rank, :rank, 1, 1].set(jnp.eye(rank, dtype=jnp.float32))
    gamma = jnp.ones((depth, width, 1, 1, 1), jnp.float32)
    bias = jnp.zeros((depth, width), jnp.float32)
    running_mean = jnp.zeros((depth, width), jnp.float32)

    padding_input_sizes = []
    p = input_size
    for _ in range(depth):
        p += (KERNEL_SIZE // 2) * 2
        padding_input_sizes.append(p)

    params = dict(weights=weights, gamma=gamma, bias=bias, identity=identity,
                  running_mean=running_mean,
                  padding_input_sizes=padding_input_sizes, scale=scale)

    x = jax.random.normal(k_x, (batch, width, input_size, input_size), jnp.float32)

    out, new_rm = ortho_conv_v2_forward(x, params)
    out = jax.block_until_ready(out)
    new_rm = jax.block_until_ready(new_rm)

    expected_spatial = input_size + depth * 2 * (KERNEL_SIZE // 2)
    assert out.shape == (batch, width, expected_spatial, expected_spatial), out.shape
    assert new_rm.shape == (depth, width)

    # Tolerance check against the plain-JAX f32 reference.
    ref_out, ref_rm = ortho_conv_v2_forward_ref(x, params)
    np.testing.assert_allclose(np.asarray(out), np.asarray(ref_out),
                               rtol=1e-3, atol=1e-3)
    np.testing.assert_allclose(np.asarray(new_rm), np.asarray(ref_rm),
                               rtol=1e-3, atol=1e-3)
    print("KERNEL_OK")
</pallas_src>

<mosaic_0001>
module attributes {stable_mosaic.version = 11 : i64} {
  func.func @_freq_mix_kernel(%arg0: i32, %arg1: memref<8x8x128xf32, #tpu.memory_space<vmem>>, %arg2: memref<8x8x128xf32, #tpu.memory_space<vmem>>, %arg3: memref<2x8x128xf32, #tpu.memory_space<vmem>>, %arg4: memref<2x8x128xf32, #tpu.memory_space<vmem>>, %arg5: memref<2x8x128xf32, #tpu.memory_space<vmem>>, %arg6: memref<2x8x128xf32, #tpu.memory_space<vmem>>) attributes {dimension_semantics = [#tpu.dimension_semantics<parallel>], iteration_bounds = array<i64: 1>, scalar_prefetch = 0 : i64, scratch_operands = 0 : i64, tpu.core_type = #tpu.core_type<tc>, window_params = [{transform_indices = @transform_0, window_bounds = array<i64: 8, 8, 128>}, {transform_indices = @transform_1, window_bounds = array<i64: 8, 8, 128>}, {transform_indices = @transform_2, window_bounds = array<i64: 2, 8, 128>}, {transform_indices = @transform_3, window_bounds = array<i64: 2, 8, 128>}, {transform_indices = @transform_4, window_bounds = array<i64: 2, 8, 128>}, {transform_indices = @transform_5, window_bounds = array<i64: 2, 8, 128>}]} {
    %c0 = arith.constant 0 : index
    %c0_0 = arith.constant 0 : index
    %c0_1 = arith.constant 0 : index
    %0 = vector.load %arg3[%c0, %c0_0, %c0_1] : memref<2x8x128xf32, #tpu.memory_space<vmem>>, vector<2x8x128xf32>
    %c0_2 = arith.constant 0 : index
    %c0_3 = arith.constant 0 : index
    %c0_4 = arith.constant 0 : index
    %1 = vector.load %arg4[%c0_2, %c0_3, %c0_4] : memref<2x8x128xf32, #tpu.memory_space<vmem>>, vector<2x8x128xf32>
    %cst = arith.constant 0.000000e+00 : f32
    %2 = vector.broadcast %cst : f32 to vector<2x8x128xf32>
    %cst_5 = arith.constant 0.000000e+00 : f32
    %3 = vector.broadcast %cst_5 : f32 to vector<2x8x128xf32>
    %c0_6 = arith.constant 0 : index
    %c0_7 = arith.constant 0 : index
    %c0_8 = arith.constant 0 : index
    %4 = vector.load %arg1[%c0_6, %c0_7, %c0_8] : memref<8x8x128xf32, #tpu.memory_space<vmem>>, vector<1x8x128xf32>
    %5 = vector.shape_cast %4 : vector<1x8x128xf32> to vector<8x128xf32>
    %6 = vector.shape_cast %5 : vector<8x128xf32> to vector<1x8x128xf32>
    %c0_9 = arith.constant 0 : index
    %c0_10 = arith.constant 0 : index
    %c0_11 = arith.constant 0 : index
    %7 = vector.load %arg2[%c0_9, %c0_10, %c0_11] : memref<8x8x128xf32, #tpu.memory_space<vmem>>, vector<1x8x128xf32>
    %8 = vector.shape_cast %7 : vector<1x8x128xf32> to vector<8x128xf32>
    %9 = vector.shape_cast %8 : vector<8x128xf32> to vector<1x8x128xf32>
    %10 = vector.extract_strided_slice %0 {offsets = [0, 0, 0], sizes = [2, 1, 128], strides = [1, 1, 1]} : vector<2x8x128xf32> to vector<2x1x128xf32>
    %11 = vector.extract_strided_slice %1 {offsets = [0, 0, 0], sizes = [2, 1, 128], strides = [1, 1, 1]} : vector<2x8x128xf32> to vector<2x1x128xf32>
    %12 = vector.broadcast %6 : vector<1x8x128xf32> to vector<2x8x128xf32>
    %13 = vector.broadcast %10 : vector<2x1x128xf32> to vector<2x8x128xf32>
    %14 = arith.mulf %12, %13 : vector<2x8x128xf32>
    %15 = arith.addf %2, %14 : vector<2x8x128xf32>
    %16 = vector.broadcast %9 : vector<1x8x128xf32> to vector<2x8x128xf32>
    %17 = vector.broadcast %11 : vector<2x1x128xf32> to vector<2x8x128xf32>
    %18 = arith.mulf %16, %17 : vector<2x8x128xf32>
    %19 = arith.subf %15, %18 : vector<2x8x128xf32>
    %20 = vector.broadcast %6 : vector<1x8x128xf32> to vector<2x8x128xf32>
    %21 = vector.broadcast %11 : vector<2x1x128xf32> to vector<2x8x128xf32>
    %22 = arith.mulf %20, %21 : vector<2x8x128xf32>
    %23 = arith.addf %3, %22 : vector<2x8x128xf32>
    %24 = vector.broadcast %9 : vector<1x8x128xf32> to vector<2x8x128xf32>
    %25 = vector.broadcast %10 : vector<2x1x128xf32> to vector<2x8x128xf32>
    %26 = arith.mulf %24, %25 : vector<2x8x128xf32>
    %27 = arith.addf %23, %26 : vector<2x8x128xf32>
    %c1 = arith.constant 1 : index
    %c0_12 = arith.constant 0 : index
    %c0_13 = arith.constant 0 : index
    %28 = vector.load %arg1[%c1, %c0_12, %c0_13] : memref<8x8x128xf32, #tpu.memory_space<vmem>>, vector<1x8x128xf32>
    %29 = vector.shape_cast %28 : vector<1x8x128xf32> to vector<8x128xf32>
    %30 = vector.shape_cast %29 : vector<8x128xf32> to vector<1x8x128xf32>
    %c1_14 = arith.constant 1 : index
    %c0_15 = arith.constant 0 : index
    %c0_16 = arith.constant 0 : index
    %31 = vector.load %arg2[%c1_14, %c0_15, %c0_16] : memref<8x8x128xf32, #tpu.memory_space<vmem>>, vector<1x8x128xf32>
    %32 = vector.shape_cast %31 : vector<1x8x128xf32> to vector<8x128xf32>
    %33 = vector.shape_cast %32 : vector<8x128xf32> to vector<1x8x128xf32>
    %34 = vector.extract_strided_slice %0 {offsets = [0, 1, 0], sizes = [2, 1, 128], strides = [1, 1, 1]} : vector<2x8x128xf32> to vector<2x1x128xf32>
    %35 = vector.extract_strided_slice %1 {offsets = [0, 1, 0], sizes = [2, 1, 128], strides = [1, 1, 1]} : vector<2x8x128xf32> to vector<2x1x128xf32>
    %36 = vector.broadcast %30 : vector<1x8x128xf32> to vector<2x8x128xf32>
    %37 = vector.broadcast %34 : vector<2x1x128xf32> to vector<2x8x128xf32>
    %38 = arith.mulf %36, %37 : vector<2x8x128xf32>
    %39 = arith.addf %19, %38 : vector<2x8x128xf32>
    %40 = vector.broadcast %33 : vector<1x8x128xf32> to vector<2x8x128xf32>
    %41 = vector.broadcast %35 : vector<2x1x128xf32> to vector<2x8x128xf32>
    %42 = arith.mulf %40, %41 : vector<2x8x128xf32>
    %43 = arith.subf %39, %42 : vector<2x8x128xf32>
    %44 = vector.broadcast %30 : vector<1x8x128xf32> to vector<2x8x128xf32>
    %45 = vector.broadcast %35 : vector<2x1x128xf32> to vector<2x8x128xf32>
    %46 = arith.mulf %44, %45 : vector<2x8x128xf32>
    %47 = arith.addf %27, %46 : vector<2x8x128xf32>
    %48 = vector.broadcast %33 : vector<1x8x128xf32> to vector<2x8x128xf32>
    %49 = vector.broadcast %34 : vector<2x1x128xf32> to vector<2x8x128xf32>
    %50 = arith.mulf %48, %49 : vector<2x8x128xf32>
    %51 = arith.addf %47, %50 : vector<2x8x128xf32>
    %c2 = arith.constant 2 : index
    %c0_17 = arith.constant 0 : index
    %c0_18 = arith.constant 0 : index
    %52 = vector.load %arg1[%c2, %c0_17, %c0_18] : memref<8x8x128xf32, #tpu.memory_space<vmem>>, vector<1x8x128xf32>
    %53 = vector.shape_cast %52 : vector<1x8x128xf32> to vector<8x128xf32>
    %54 = vector.shape_cast %53 : vector<8x128xf32> to vector<1x8x128xf32>
    %c2_19 = arith.constant 2 : index
    %c0_20 = arith.constant 0 : index
    %c0_21 = arith.constant 0 : index
    %55 = vector.load %arg2[%c2_19, %c0_20, %c0_21] : memref<8x8x128xf32, #tpu.memory_space<vmem>>, vector<1x8x128xf32>
    %56 = vector.shape_cast %55 : vector<1x8x128xf32> to vector<8x128xf32>
    %57 = vector.shape_cast %56 : vector<8x128xf32> to vector<1x8x128xf32>
    %58 = vector.extract_strided_slice %0 {offsets = [0, 2, 0], sizes = [2, 1, 128], strides = [1, 1, 1]} : vector<2x8x128xf32> to vector<2x1x128xf32>
    %59 = vector.extract_strided_slice %1 {offsets = [0, 2, 0], sizes = [2, 1, 128], strides = [1, 1, 1]} : vector<2x8x128xf32> to vector<2x1x128xf32>
    %60 = vector.broadcast %54 : vector<1x8x128xf32> to vector<2x8x128xf32>
    %61 = vector.broadcast %58 : vector<2x1x128xf32> to vector<2x8x128xf32>
    %62 = arith.mulf %60, %61 : vector<2x8x128xf32>
    %63 = arith.addf %43, %62 : vector<2x8x128xf32>
    %64 = vector.broadcast %57 : vector<1x8x128xf32> to vector<2x8x128xf32>
    %65 = vector.broadcast %59 : vector<2x1x128xf32> to vector<2x8x128xf32>
    %66 = arith.mulf %64, %65 : vector<2x8x128xf32>
    %67 = arith.subf %63, %66 : vector<2x8x128xf32>
    %68 = vector.broadcast %54 : vector<1x8x128xf32> to vector<2x8x128xf32>
    %69 = vector.broadcast %59 : vector<2x1x128xf32> to vector<2x8x128xf32>
    %70 = arith.mulf %68, %69 : vector<2x8x128xf32>
    %71 = arith.addf %51, %70 : vector<2x8x128xf32>
    %72 = vector.broadcast %57 : vector<1x8x128xf32> to vector<2x8x128xf32>
    %73 = vector.broadcast %58 : vector<2x1x128xf32> to vector<2x8x128xf32>
    %74 = arith.mulf %72, %73 : vector<2x8x128xf32>
    %75 = arith.addf %71, %74 : vector<2x8x128xf32>
    %c3 = arith.constant 3 : index
    %c0_22 = arith.constant 0 : index
    %c0_23 = arith.constant 0 : index
    %76 = vector.load %arg1[%c3, %c0_22, %c0_23] : memref<8x8x128xf32, #tpu.memory_space<vmem>>, vector<1x8x128xf32>
    %77 = vector.shape_cast %76 : vector<1x8x128xf32> to vector<8x128xf32>
    %78 = vector.shape_cast %77 : vector<8x128xf32> to vector<1x8x128xf32>
    %c3_24 = arith.constant 3 : index
    %c0_25 = arith.constant 0 : index
    %c0_26 = arith.constant 0 : index
    %79 = vector.load %arg2[%c3_24, %c0_25, %c0_26] : memref<8x8x128xf32, #tpu.memory_space<vmem>>, vector<1x8x128xf32>
    %80 = vector.shape_cast %79 : vector<1x8x128xf32> to vector<8x128xf32>
    %81 = vector.shape_cast %80 : vector<8x128xf32> to vector<1x8x128xf32>
    %82 = vector.extract_strided_slice %0 {offsets = [0, 3, 0], sizes = [2, 1, 128], strides = [1, 1, 1]} : vector<2x8x128xf32> to vector<2x1x128xf32>
    %83 = vector.extract_strided_slice %1 {offsets = [0, 3, 0], sizes = [2, 1, 128], strides = [1, 1, 1]} : vector<2x8x128xf32> to vector<2x1x128xf32>
    %84 = vector.broadcast %78 : vector<1x8x128xf32> to vector<2x8x128xf32>
    %85 = vector.broadcast %82 : vector<2x1x128xf32> to vector<2x8x128xf32>
    %86 = arith.mulf %84, %85 : vector<2x8x128xf32>
    %87 = arith.addf %67, %86 : vector<2x8x128xf32>
    %88 = vector.broadcast %81 : vector<1x8x128xf32> to vector<2x8x128xf32>
    %89 = vector.broadcast %83 : vector<2x1x128xf32> to vector<2x8x128xf32>
    %90 = arith.mulf %88, %89 : vector<2x8x128xf32>
    %91 = arith.subf %87, %90 : vector<2x8x128xf32>
    %92 = vector.broadcast %78 : vector<1x8x128xf32> to vector<2x8x128xf32>
    %93 = vector.broadcast %83 : vector<2x1x128xf32> to vector<2x8x128xf32>
    %94 = arith.mulf %92, %93 : vector<2x8x128xf32>
    %95 = arith.addf %75, %94 : vector<2x8x128xf32>
    %96 = vector.broadcast %81 : vector<1x8x128xf32> to vector<2x8x128xf32>
    %97 = vector.broadcast %82 : vector<2x1x128xf32> to vector<2x8x128xf32>
    %98 = arith.mulf %96, %97 : vector<2x8x128xf32>
    %99 = arith.addf %95, %98 : vector<2x8x128xf32>
    %c4 = arith.constant 4 : index
    %c0_27 = arith.constant 0 : index
    %c0_28 = arith.constant 0 : index
    %100 = vector.load %arg1[%c4, %c0_27, %c0_28] : memref<8x8x128xf32, #tpu.memory_space<vmem>>, vector<1x8x128xf32>
    %101 = vector.shape_cast %100 : vector<1x8x128xf32> to vector<8x128xf32>
    %102 = vector.shape_cast %101 : vector<8x128xf32> to vector<1x8x128xf32>
    %c4_29 = arith.constant 4 : index
    %c0_30 = arith.constant 0 : index
    %c0_31 = arith.constant 0 : index
    %103 = vector.load %arg2[%c4_29, %c0_30, %c0_31] : memref<8x8x128xf32, #tpu.memory_space<vmem>>, vector<1x8x128xf32>
    %104 = vector.shape_cast %103 : vector<1x8x128xf32> to vector<8x128xf32>
    %105 = vector.shape_cast %104 : vector<8x128xf32> to vector<1x8x128xf32>
    %106 = vector.extract_strided_slice %0 {offsets = [0, 4, 0], sizes = [2, 1, 128], strides = [1, 1, 1]} : vector<2x8x128xf32> to vector<2x1x128xf32>
    %107 = vector.extract_strided_slice %1 {offsets = [0, 4, 0], sizes = [2, 1, 128], strides = [1, 1, 1]} : vector<2x8x128xf32> to vector<2x1x128xf32>
    %108 = vector.broadcast %102 : vector<1x8x128xf32> to vector<2x8x128xf32>
    %109 = vector.broadcast %106 : vector<2x1x128xf32> to vector<2x8x128xf32>
    %110 = arith.mulf %108, %109 : vector<2x8x128xf32>
    %111 = arith.addf %91, %110 : vector<2x8x128xf32>
    %112 = vector.broadcast %105 : vector<1x8x128xf32> to vector<2x8x128xf32>
    %113 = vector.broadcast %107 : vector<2x1x128xf32> to vector<2x8x128xf32>
    %114 = arith.mulf %112, %113 : vector<2x8x128xf32>
    %115 = arith.subf %111, %114 : vector<2x8x128xf32>
    %116 = vector.broadcast %102 : vector<1x8x128xf32> to vector<2x8x128xf32>
    %117 = vector.broadcast %107 : vector<2x1x128xf32> to vector<2x8x128xf32>
    %118 = arith.mulf %116, %117 : vector<2x8x128xf32>
    %119 = arith.addf %99, %118 : vector<2x8x128xf32>
    %120 = vector.broadcast %105 : vector<1x8x128xf32> to vector<2x8x128xf32>
    %121 = vector.broadcast %106 : vector<2x1x128xf32> to vector<2x8x128xf32>
    %122 = arith.mulf %120, %121 : vector<2x8x128xf32>
    %123 = arith.addf %119, %122 : vector<2x8x128xf32>
    %c5 = arith.constant 5 : index
    %c0_32 = arith.constant 0 : index
    %c0_33 = arith.constant 0 : index
    %124 = vector.load %arg1[%c5, %c0_32, %c0_33] : memref<8x8x128xf32, #tpu.memory_space<vmem>>, vector<1x8x128xf32>
    %125 = vector.shape_cast %124 : vector<1x8x128xf32> to vector<8x128xf32>
    %126 = vector.shape_cast %125 : vector<8x128xf32> to vector<1x8x128xf32>
    %c5_34 = arith.constant 5 : index
    %c0_35 = arith.constant 0 : index
    %c0_36 = arith.constant 0 : index
    %127 = vector.load %arg2[%c5_34, %c0_35, %c0_36] : memref<8x8x128xf32, #tpu.memory_space<vmem>>, vector<1x8x128xf32>
    %128 = vector.shape_cast %127 : vector<1x8x128xf32> to vector<8x128xf32>
    %129 = vector.shape_cast %128 : vector<8x128xf32> to vector<1x8x128xf32>
    %130 = vector.extract_strided_slice %0 {offsets = [0, 5, 0], sizes = [2, 1, 128], strides = [1, 1, 1]} : vector<2x8x128xf32> to vector<2x1x128xf32>
    %131 = vector.extract_strided_slice %1 {offsets = [0, 5, 0], sizes = [2, 1, 128], strides = [1, 1, 1]} : vector<2x8x128xf32> to vector<2x1x128xf32>
    %132 = vector.broadcast %126 : vector<1x8x128xf32> to vector<2x8x128xf32>
    %133 = vector.broadcast %130 : vector<2x1x128xf32> to vector<2x8x128xf32>
    %134 = arith.mulf %132, %133 : vector<2x8x128xf32>
    %135 = arith.addf %115, %134 : vector<2x8x128xf32>
    %136 = vector.broadcast %129 : vector<1x8x128xf32> to vector<2x8x128xf32>
    %137 = vector.broadcast %131 : vector<2x1x128xf32> to vector<2x8x128xf32>
    %138 = arith.mulf %136, %137 : vector<2x8x128xf32>
    %139 = arith.subf %135, %138 : vector<2x8x128xf32>
    %140 = vector.broadcast %126 : vector<1x8x128xf32> to vector<2x8x128xf32>
    %141 = vector.broadcast %131 : vector<2x1x128xf32> to vector<2x8x128xf32>
    %142 = arith.mulf %140, %141 : vector<2x8x128xf32>
    %143 = arith.addf %123, %142 : vector<2x8x128xf32>
    %144 = vector.broadcast %129 : vector<1x8x128xf32> to vector<2x8x128xf32>
    %145 = vector.broadcast %130 : vector<2x1x128xf32> to vector<2x8x128xf32>
    %146 = arith.mulf %144, %145 : vector<2x8x128xf32>
    %147 = arith.addf %143, %146 : vector<2x8x128xf32>
    %c6 = arith.constant 6 : index
    %c0_37 = arith.constant 0 : index
    %c0_38 = arith.constant 0 : index
    %148 = vector.load %arg1[%c6, %c0_37, %c0_38] : memref<8x8x128xf32, #tpu.memory_space<vmem>>, vector<1x8x128xf32>
    %149 = vector.shape_cast %148 : vector<1x8x128xf32> to vector<8x128xf32>
    %150 = vector.shape_cast %149 : vector<8x128xf32> to vector<1x8x128xf32>
    %c6_39 = arith.constant 6 : index
    %c0_40 = arith.constant 0 : index
    %c0_41 = arith.constant 0 : index
    %151 = vector.load %arg2[%c6_39, %c0_40, %c0_41] : memref<8x8x128xf32, #tpu.memory_space<vmem>>, vector<1x8x128xf32>
    %152 = vector.shape_cast %151 : vector<1x8x128xf32> to vector<8x128xf32>
    %153 = vector.shape_cast %152 : vector<8x128xf32> to vector<1x8x128xf32>
    %154 = vector.extract_strided_slice %0 {offsets = [0, 6, 0], sizes = [2, 1, 128], strides = [1, 1, 1]} : vector<2x8x128xf32> to vector<2x1x128xf32>
    %155 = vector.extract_strided_slice %1 {offsets = [0, 6, 0], sizes = [2, 1, 128], strides = [1, 1, 1]} : vector<2x8x128xf32> to vector<2x1x128xf32>
    %156 = vector.broadcast %150 : vector<1x8x128xf32> to vector<2x8x128xf32>
    %157 = vector.broadcast %154 : vector<2x1x128xf32> to vector<2x8x128xf32>
    %158 = arith.mulf %156, %157 : vector<2x8x128xf32>
    %159 = arith.addf %139, %158 : vector<2x8x128xf32>
    %160 = vector.broadcast %153 : vector<1x8x128xf32> to vector<2x8x128xf32>
    %161 = vector.broadcast %155 : vector<2x1x128xf32> to vector<2x8x128xf32>
    %162 = arith.mulf %160, %161 : vector<2x8x128xf32>
    %163 = arith.subf %159, %162 : vector<2x8x128xf32>
    %164 = vector.broadcast %150 : vector<1x8x128xf32> to vector<2x8x128xf32>
    %165 = vector.broadcast %155 : vector<2x1x128xf32> to vector<2x8x128xf32>
    %166 = arith.mulf %164, %165 : vector<2x8x128xf32>
    %167 = arith.addf %147, %166 : vector<2x8x128xf32>
    %168 = vector.broadcast %153 : vector<1x8x128xf32> to vector<2x8x128xf32>
    %169 = vector.broadcast %154 : vector<2x1x128xf32> to vector<2x8x128xf32>
    %170 = arith.mulf %168, %169 : vector<2x8x128xf32>
    %171 = arith.addf %167, %170 : vector<2x8x128xf32>
    %c7 = arith.constant 7 : index
    %c0_42 = arith.constant 0 : index
    %c0_43 = arith.constant 0 : index
    %172 = vector.load %arg1[%c7, %c0_42, %c0_43] : memref<8x8x128xf32, #tpu.memory_space<vmem>>, vector<1x8x128xf32>
    %173 = vector.shape_cast %172 : vector<1x8x128xf32> to vector<8x128xf32>
    %174 = vector.shape_cast %173 : vector<8x128xf32> to vector<1x8x128xf32>
    %c7_44 = arith.constant 7 : index
    %c0_45 = arith.constant 0 : index
    %c0_46 = arith.constant 0 : index
    %175 = vector.load %arg2[%c7_44, %c0_45, %c0_46] : memref<8x8x128xf32, #tpu.memory_space<vmem>>, vector<1x8x128xf32>
    %176 = vector.shape_cast %175 : vector<1x8x128xf32> to vector<8x128xf32>
    %177 = vector.shape_cast %176 : vector<8x128xf32> to vector<1x8x128xf32>
    %178 = vector.extract_strided_slice %0 {offsets = [0, 7, 0], sizes = [2, 1, 128], strides = [1, 1, 1]} : vector<2x8x128xf32> to vector<2x1x128xf32>
    %179 = vector.extract_strided_slice %1 {offsets = [0, 7, 0], sizes = [2, 1, 128], strides = [1, 1, 1]} : vector<2x8x128xf32> to vector<2x1x128xf32>
    %180 = vector.broadcast %174 : vector<1x8x128xf32> to vector<2x8x128xf32>
    %181 = vector.broadcast %178 : vector<2x1x128xf32> to vector<2x8x128xf32>
    %182 = arith.mulf %180, %181 : vector<2x8x128xf32>
    %183 = arith.addf %163, %182 : vector<2x8x128xf32>
    %184 = vector.broadcast %177 : vector<1x8x128xf32> to vector<2x8x128xf32>
    %185 = vector.broadcast %179 : vector<2x1x128xf32> to vector<2x8x128xf32>
    %186 = arith.mulf %184, %185 : vector<2x8x128xf32>
    %187 = arith.subf %183, %186 : vector<2x8x128xf32>
    %188 = vector.broadcast %174 : vector<1x8x128xf32> to vector<2x8x128xf32>
    %189 = vector.broadcast %179 : vector<2x1x128xf32> to vector<2x8x128xf32>
    %190 = arith.mulf %188, %189 : vector<2x8x128xf32>
    %191 = arith.addf %171, %190 : vector<2x8x128xf32>
    %192 = vector.broadcast %177 : vector<1x8x128xf32> to vector<2x8x128xf32>
    %193 = vector.broadcast %178 : vector<2x1x128xf32> to vector<2x8x128xf32>
    %194 = arith.mulf %192, %193 : vector<2x8x128xf32>
    %195 = arith.addf %191, %194 : vector<2x8x128xf32>
    %c0_47 = arith.constant 0 : index
    %c0_48 = arith.constant 0 : index
    %c0_49 = arith.constant 0 : index
    %196 = vector.load %arg5[%c0_47, %c0_48, %c0_49] : memref<2x8x128xf32, #tpu.memory_space<vmem>>, vector<2x8x128xf32>
    tpu.vector_store %arg5[%c0_47, %c0_48, %c0_49], %187 {strides = array<i32>} : memref<2x8x128xf32, #tpu.memory_space<vmem>>, vector<2x8x128xf32>,
    %c0_50 = arith.constant 0 : index
    %c0_51 = arith.constant 0 : index
    %c0_52 = arith.constant 0 : index
    %197 = vector.load %arg6[%c0_50, %c0_51, %c0_52] : memref<2x8x128xf32, #tpu.memory_space<vmem>>, vector<2x8x128xf32>
    tpu.vector_store %arg6[%c0_50, %c0_51, %c0_52], %195 {strides = array<i32>} : memref<2x8x128xf32, #tpu.memory_space<vmem>>, vector<2x8x128xf32>,
    return
  }
  func.func @transform_0(%arg0: i32) -> (i32, i32, i32) {
    %c0_i32 = arith.constant 0 : i32
    %c0_i32_0 = arith.constant 0 : i32
    %c0_i32_1 = arith.constant 0 : i32
    return %c0_i32, %c0_i32_0, %arg0 : i32, i32, i32
  }
  func.func @transform_1(%arg0: i32) -> (i32, i32, i32) {
    %c0_i32 = arith.constant 0 : i32
    %c0_i32_0 = arith.constant 0 : i32
    %c0_i32_1 = arith.constant 0 : i32
    return %c0_i32, %c0_i32_0, %arg0 : i32, i32, i32
  }
  func.func @transform_2(%arg0: i32) -> (i32, i32, i32) {
    %c0_i32 = arith.constant 0 : i32
    %c0_i32_0 = arith.constant 0 : i32
    %c0_i32_1 = arith.constant 0 : i32
    return %c0_i32, %c0_i32_0, %arg0 : i32, i32, i32
  }
  func.func @transform_3(%arg0: i32) -> (i32, i32, i32) {
    %c0_i32 = arith.constant 0 : i32
    %c0_i32_0 = arith.constant 0 : i32
    %c0_i32_1 = arith.constant 0 : i32
    return %c0_i32, %c0_i32_0, %arg0 : i32, i32, i32
  }
  func.func @transform_4(%arg0: i32) -> (i32, i32, i32) {
    %c0_i32 = arith.constant 0 : i32
    %c0_i32_0 = arith.constant 0 : i32
    %c0_i32_1 = arith.constant 0 : i32
    return %c0_i32, %c0_i32_0, %arg0 : i32, i32, i32
  }
  func.func @transform_5(%arg0: i32) -> (i32, i32, i32) {
    %c0_i32 = arith.constant 0 : i32
    %c0_i32_0 = arith.constant 0 : i32
    %c0_i32_1 = arith.constant 0 : i32
    return %c0_i32, %c0_i32_0, %arg0 : i32, i32, i32
  }
}

</mosaic_0001>

<bundles_post_ra>
// kernel: tpu_custom_call.1
= control target key start
LH: loop header
LB: loop body
LE: loop exit
PB: predicated region body
PF: predicated region fallthrough
CT: control target
= control target key end

     0   :  { %11 = vsyncpa [#allocation3], 0  ;;  %s983_s0 = inlined_call_operand.hbm [shape: f32[8,8,128], index: 0, kind: input, shape index: {}]   ;;  %s984_s1 = inlined_call_operand.hbm [shape: f32[8,8,128], index: 1, kind: input, shape index: {}]   ;;  %s985_s2 = inlined_call_operand.hbm [shape: f32[2,8,128], index: 2, kind: input, shape index: {}]   ;;  %s986_s3 = inlined_call_operand.hbm [shape: f32[2,8,128], index: 3, kind: input, shape index: {}]   ;;  %s987_s4 = inlined_call_operand.hbm [shape: f32[2,8,128], index: 4, kind: output, shape index: {0}]   ;;  %s988_s5 = inlined_call_operand.hbm [shape: f32[2,8,128], index: 5, kind: output, shape index: {1}]  }
   0x1   :  { %12 = vsyncpa [#allocation6], 0 }
   0x2   :  { %13 = vsyncpa [#allocation9], 0 }
   0x3   :  { %14 = vsyncpa [#allocation4], 0 }
   0x4   :  { %15 = vsyncpa [#allocation12], 0  ;;  %s555_s18 = smov [#allocation5]   ;;  %s556_s20 = smov [#allocation2]  }
   0x5   :  { %s33_s19 = sshll.u32 %s555_s18, 4  ;;  %s21_s21 = sshll.u32 %s556_s20, 4  ;;  %s34_s19 = int_to_ptr.vmem [resolvable:$true] %s33_s19  ;;  %s593_s21 = int_to_ptr.vmem [resolvable:$true] %s21_s21 }
   0x6   :  { %s413_s24 = scalar_lea.hbm %s984_s1, 1024 }
   0x7   :  { %p414_p0 = scmp.ne.s32.totalorder %s984_s1, %s413_s24  ;;  %p417_p1 = scmp.lt.u32.totalorder %s413_s24, %s984_s1 }
   0x9   :  { %p419_p2 = pnand %p417_p1, %p414_p0 }
   0xb   :  { %422 = shalt.err (!%p419_p2)
}
   0xc   :  { %s423_s29 = scalar_lea.vmem %s34_s19, 1024  ;;  %p428_p4 = scmp.lt.s32.totalorder %s34_s19, %s34_s19 }
   0xd   :  { %p424_p3 = scmp.ne.s32.totalorder %s34_s19, %s423_s29  ;;  %p429_p5 = scmp.lt.s32.totalorder %s423_s29, %s423_s29 }
   0xf   :  { %p430_p6 = por %p429_p5, %p428_p4 }
  0x11   :  { %p431_p7 = pnand %p430_p6, %p424_p3 }
  0x13   :  { %434 = shalt.err (!%p431_p7)
}
  0x14   :  { %s557_s30 = smov 128   ;;  %s558_s6 = smov 8  }
  0x15   :  { %39 = dma.hbm_to_vmem [thread:$0]  %s984_s1, 1024, %s34_s19, [#allocation6], %s557_s30, %s557_s30, %s558_s6  }
  0x16   :  { %s435_s11 = scalar_lea.hbm %s983_s0, 1024 }
  0x17   :  { %p436_p8 = scmp.ne.s32.totalorder %s983_s0, %s435_s11  ;;  %p439_p9 = scmp.lt.u32.totalorder %s435_s11, %s983_s0 }
  0x19   :  { %p441_p10 = pnand %p439_p9, %p436_p8 }
  0x1b   :  { %444 = shalt.err (!%p441_p10)
}
  0x1c   :  { %s445_s16 = scalar_lea.vmem %s593_s21, 1024  ;;  %p450_p12 = scmp.lt.s32.totalorder %s593_s21, %s593_s21 }
  0x1d   :  { %p446_p11 = scmp.ne.s32.totalorder %s593_s21, %s445_s16  ;;  %p451_p13 = scmp.lt.s32.totalorder %s445_s16, %s445_s16 }
  0x1f   :  { %p452_p0 = por %p451_p13, %p450_p12 }
  0x21   :  { %p453_p1 = pnand %p452_p0, %p446_p11 }
  0x23   :  { %456 = shalt.err (!%p453_p1)
}
  0x24   :  { %27 = dma.hbm_to_vmem [thread:$0]  %s983_s0, 1024, %s593_s21, [#allocation3], %s557_s30, %s557_s30, %s558_s6  }
  0x25   :  { %s559_s18 = smov [#allocation7]   ;;  %s560_s20 = smov [#allocation8]  }
  0x26   :  { %s45_s19 = sshll.u32 %s559_s18, 4  ;;  %s57_s22 = sshll.u32 %s560_s20, 4  ;;  %s46_s19 = int_to_ptr.vmem [resolvable:$true] %s45_s19  ;;  %s630_s22 = int_to_ptr.vmem [resolvable:$true] %s57_s22 }
  0x27   :  { %s457_s25 = scalar_lea.hbm %s985_s2, 256 }
  0x28   :  { %p458_p2 = scmp.ne.s32.totalorder %s985_s2, %s457_s25  ;;  %p461_p3 = scmp.lt.u32.totalorder %s457_s25, %s985_s2 }
  0x2a   :  { %p463_p4 = pnand %p461_p3, %p458_p2 }
  0x2c   :  { %466 = shalt.err (!%p463_p4)
}
  0x2d   :  { %s467_s0 = scalar_lea.vmem %s46_s19, 256  ;;  %p472_p6 = scmp.lt.s32.totalorder %s46_s19, %s46_s19 }
  0x2e   :  { %p468_p5 = scmp.ne.s32.totalorder %s46_s19, %s467_s0  ;;  %p473_p7 = scmp.lt.s32.totalorder %s467_s0, %s467_s0 }
  0x30   :  { %p474_p8 = por %p473_p7, %p472_p6 }
  0x32   :  { %p475_p9 = pnand %p474_p8, %p468_p5 }
  0x34   :  { %478 = shalt.err (!%p475_p9)
}
  0x35   :  { %51 = dma.hbm_to_vmem [thread:$0]  %s985_s2, 256, %s46_s19, [#allocation6], %s557_s30, %s557_s30, %s558_s6  }
  0x36   :  { %s479_s10 = scalar_lea.hbm %s986_s3, 256 }
  0x37   :  { %p480_p10 = scmp.ne.s32.totalorder %s986_s3, %s479_s10  ;;  %p483_p11 = scmp.lt.u32.totalorder %s479_s10, %s986_s3 }
  0x39   :  { %p485_p12 = pnand %p483_p11, %p480_p10 }
  0x3b   :  { %488 = shalt.err (!%p485_p12)
}
  0x3c   :  { %s489_s15 = scalar_lea.vmem %s630_s22, 256  ;;  %p494_p0 = scmp.lt.s32.totalorder %s630_s22, %s630_s22 }
  0x3d   :  { %p490_p13 = scmp.ne.s32.totalorder %s630_s22, %s489_s15  ;;  %p495_p1 = scmp.lt.s32.totalorder %s489_s15, %s489_s15 }
  0x3f   :  { %p496_p2 = por %p495_p1, %p494_p0 }
  0x41   :  { %p497_p3 = pnand %p496_p2, %p490_p13 }
  0x43   :  { %500 = shalt.err (!%p497_p3)
}
  0x44   :  { %63 = dma.hbm_to_vmem [thread:$0]  %s986_s3, 256, %s630_s22, [#allocation9], %s557_s30, %s557_s30, %s558_s6  }
  0x45   :  { %545 = dma.done.wait [#allocation3], 1024  }
  0x46   :  { %546 = vsyncadd [#allocation3], 4294966272 }
  0x47   :  { %547 = dma.done.wait [#allocation6], 1280  }
  0x48   :  { %548 = vsyncadd [#allocation6], 4294966016 }
  0x49   :  { %549 = dma.done.wait [#allocation9], 256  }
  0x4a   :  { %550 = vsyncadd [#allocation9], 4294967040  ;;  %v82_v0 = vlaneseq  ;;  %v667_v5 = vld [vmem:[#allocation7] sm:$0xff]  ;;  %v669_v6 = vld [vmem:[#allocation8] sm:$0xff]  ;;  %s561_s3 = smov [#allocation10]  }
  0x4b   :  { %v671_v7 = vld [vmem:[#allocation2] sm:$0xff]  ;;  %v681_v11 = vld [vmem:[#allocation2 + $0x8] sm:$0xff]  ;;  %v702_v20 = vld [vmem:[#allocation2 + $0x10] sm:$0xff]  ;;  %s375_s1 = sshll.u32 %s561_s3, 4  ;;  %s376_s1 = int_to_ptr.vmem [resolvable:$true] %s375_s1 }
  0x4c   :  { %v83_v1 = vshrl.u32 %v82_v0, 7  ;;  %v673_v8 = vld [vmem:[#allocation5] sm:$0xff]  ;;  %v686_v13 = vld [vmem:[#allocation5 + $0x8] sm:$0xff]  ;;  %v706_v23 = vld [vmem:[#allocation5 + $0x10] sm:$0xff]  ;;  %s501_s17 = scalar_lea.vmem %s376_s1, 256  ;;  %p506_p5 = scmp.lt.s32.totalorder %s376_s1, %s376_s1 }
  0x4d   :  { %v714_v26 = vld [vmem:[#allocation7 + $0x8] sm:$0xff]  ;;  %v716_v27 = vld [vmem:[#allocation8 + $0x8] sm:$0xff]  ;;  %v755_v45 = vld [vmem:[#allocation2 + $0x20] sm:$0xff]  ;;  %p502_p4 = scmp.ne.s32.totalorder %s376_s1, %s501_s17  ;;  %p507_p6 = scmp.lt.s32.totalorder %s501_s17, %s501_s17 }
  0x4e   :  { %v84_v2 = vsub.s32 0, %v83_v1  ;;  %v120_v3 = vsub.s32 1, %v83_v1  ;;  %v156_v4 = vsub.s32 2, %v83_v1  ;;  %v691_v15 = vsub.s32 3, %v83_v1  ;;  %v723_v31 = vld [vmem:[#allocation2 + $0x18] sm:$0xff]  ;;  %v774_v54 = vld [vmem:[#allocation5 + $0x20] sm:$0xff] }
  0x4f   :  { %v712_v25 = vsub.s32 4, %v83_v1  ;;  %v729_v33 = vsub.s32 5, %v83_v1  ;;  %v731_v34 = vsub.s32 6, %v83_v1  ;;  %v735_v37 = vld [vmem:[#allocation5 + $0x18] sm:$0xff]  ;;  %v770_v51 = vsub.s32 7, %v83_v1  ;;  %v780_v56 = vld [vmem:[#allocation2 + $0x28] sm:$0xff]  ;;  %p508_p7 = por %p507_p6, %p506_p5 }
  0x50   :  { %v676_v9 = vrot.slane %v667_v5, %v84_v2  ;;  %v679_v10 = vrot.slane %v669_v6, %v84_v2  ;;  %v684_v12 = vrot.slane %v667_v5, %v120_v3  ;;  %v689_v14 = vrot.slane %v669_v6, %v120_v3  ;;  %v786_v60 = vld [vmem:[#allocation5 + $0x28] sm:$0xff]  ;;  %v799_v1 = vld [vmem:[#allocation2 + $0x30] sm:$0xff] }
  0x51   :  { %v700_v19 = vrot.slane %v667_v5, %v156_v4  ;;  %v710_v24 = vrot.slane %v667_v5, %v691_v15  ;;  %v721_v30 = vrot.slane %v669_v6, %v156_v4  ;;  %v727_v32 = vrot.slane %v669_v6, %v691_v15  ;;  %p509_p8 = pnand %p508_p7, %p502_p4 }
  0x52   :  { %v90_v16 = vmul.f32 %v676_v9, %v671_v7  ;;  %v102_v17 = vmul.f32 %v679_v10, %v673_v8  ;;  %v126_v18 = vmul.f32 %v684_v12, %v681_v11  ;;  %v138_v22 = vmul.f32 %v689_v14, %v686_v13 }
  0x53   :  { %v162_v29 = vmul.f32 %v700_v19, %v702_v20  ;;  %v174_v36 = vmul.f32 %v721_v30, %v706_v23  ;;  %v738_v38 = vrot.slane %v714_v26, %v84_v2  ;;  %v741_v39 = vrot.slane %v716_v27, %v84_v2 }
  0x54   :  { %v104_v21 = vsub.f32 %v90_v16, %v102_v17  ;;  %v198_v40 = vmul.f32 %v710_v24, %v723_v31  ;;  %v747_v41 = vrot.slane %v667_v5, %v712_v25  ;;  %v750_v42 = vrot.slane %v714_v26, %v120_v3 }
  0x55   :  { %v753_v43 = vrot.slane %v716_v27, %v120_v3  ;;  %v91_v46 = vmul.f32 %v738_v38, %v671_v7  ;;  %v103_v47 = vmul.f32 %v741_v39, %v673_v8  ;;  %v762_v48 = vrot.slane %v714_v26, %v156_v4 }
  0x56   :  { %v128_v28 = vadd.f32 %v126_v18, %v104_v21  ;;  %v210_v49 = vmul.f32 %v727_v32, %v735_v37  ;;  %v768_v50 = vrot.slane %v667_v5, %v729_v33  ;;  %v127_v52 = vmul.f32 %v750_v42, %v681_v11 }
  0x57   :  { %v778_v55 = vrot.slane %v669_v6, %v712_v25  ;;  %v105_v57 = vsub.f32 %v91_v46, %v103_v47  ;;  %v139_v58 = vmul.f32 %v753_v43, %v686_v13  ;;  %v234_v59 = vmul.f32 %v747_v41, %v755_v45 }
  0x58   :  { %v140_v35 = vsub.f32 %v128_v28, %v138_v22  ;;  %v790_v61 = vrot.slane %v669_v6, %v729_v33  ;;  %v794_v62 = vrot.slane %v667_v5, %v731_v34  ;;  %v797_v63 = vrot.slane %v716_v27, %v156_v4 }
  0x59   :  { %v129_v2 = vadd.f32 %v127_v52, %v105_v57  ;;  %v163_v3 = vmul.f32 %v762_v48, %v702_v20  ;;  %v805_v16 = vrot.slane %v714_v26, %v691_v15  ;;  %v246_v17 = vmul.f32 %v778_v55, %v774_v54 }
  0x5a   :  { %v164_v44 = vadd.f32 %v162_v29, %v140_v35  ;;  %990 = vst [vmem:[#allocation18_spill] sm:$0xff] %v794_v62  ;;  %v270_v18 = vmul.f32 %v768_v50, %v780_v56  ;;  %v813_v4 = vrot.slane %v669_v6, %v731_v34  ;;  %v817_v21 = vrot.slane %v667_v5, %v770_v51  ;;  %v821_v29 = vld [vmem:[#allocation5 + $0x30] sm:$0xff] }
  0x5b   :  { %v282_v28 = vmul.f32 %v790_v61, %v786_v60  ;;  %v141_v35 = vsub.f32 %v129_v2, %v139_v58  ;;  %v106_v5 = vmul.f32 %v679_v10, %v671_v7  ;;  %v110_v46 = vmul.f32 %v676_v9, %v673_v8 }
  0x5c   :  { %v176_v53 = vsub.f32 %v164_v44, %v174_v36  ;;  %v175_v36 = vmul.f32 %v797_v63, %v706_v23  ;;  %v829_v44 = vrot.slane %v716_v27, %v691_v15  ;;  %v841_v57 = vrot.slane %v714_v26, %v712_v25 }
  0x5d   :  { %v165_v52 = vadd.f32 %v163_v3, %v141_v35  ;;  %v318_v15 = vmul.f32 %v813_v4, %v821_v29  ;;  %v847_v10 = vrot.slane %v714_v26, %v729_v33  ;;  %v112_v58 = vadd.f32 %v110_v46, %v106_v5 }
  0x5e   :  { %v200_v0 = vadd.f32 %v198_v40, %v176_v53  ;;  %v306_v40 = vmul.f32 %v794_v62, %v799_v1  ;;  %v199_v53 = vmul.f32 %v805_v16, %v723_v31  ;;  %v142_v9 = vmul.f32 %v689_v14, %v681_v11 }
  0x5f   :  { %v177_v2 = vsub.f32 %v165_v52, %v175_v36  ;;  %v211_v3 = vmul.f32 %v829_v44, %v735_v37  ;;  %v861_v62 = vrot.slane %v669_v6, %v770_v51  ;;  %v178_v14 = vmul.f32 %v721_v30, %v702_v20 }
  0x60   :  { %v212_v22 = vsub.f32 %v200_v0, %v210_v49  ;;  %v835_v49 = vld [vmem:[#allocation2 + $0x38] sm:$0xff]  ;;  %v144_v5 = vadd.f32 %v142_v9, %v112_v58  ;;  %v235_v36 = vmul.f32 %v841_v57, %v755_v45  ;;  %v873_v52 = vrot.slane %v716_v27, %v729_v33 }
  0x61   :  { %v851_v0 = vld [vmem:[#allocation5 + $0x38] sm:$0xff]  ;;  %v342_v35 = vmul.f32 %v817_v21, %v835_v49  ;;  %v201_v46 = vadd.f32 %v199_v53, %v177_v2  ;;  %v182_v58 = vmul.f32 %v700_v19, %v706_v23  ;;  %v271_v9 = vmul.f32 %v847_v10, %v780_v56 }
  0x62   :  { %v236_v47 = vadd.f32 %v234_v59, %v212_v22  ;;  %v146_v22 = vmul.f32 %v684_v12, %v686_v13  ;;  %v354_v12 = vmul.f32 %v861_v62, %v851_v0  ;;  %v107_v2 = vmul.f32 %v741_v39, %v671_v7 }
  0x63   :  { %v111_v33 = vmul.f32 %v738_v38, %v673_v8  ;;  %v888_v19 = vrot.slane %v714_v26, %v731_v34  ;;  %v147_v7 = vmul.f32 %v750_v42, %v686_v13  ;;  %v283_v8 = vmul.f32 %v873_v52, %v786_v60 }
  0x64   :  { %v248_v59 = vsub.f32 %v236_v47, %v246_v17  ;;  %v245_v47 = vrot.slane %v716_v27, %v712_v25  ;;  %v148_v6 = vadd.f32 %v146_v22, %v144_v5  ;;  %v214_v25 = vmul.f32 %v727_v32, %v723_v31 }
  0x65   :  { %v113_v32 = vadd.f32 %v111_v33, %v107_v2  ;;  %v900_v38 = vrot.slane %v716_v27, %v731_v34  ;;  %v307_v13 = vmul.f32 %v888_v19, %v799_v1  ;;  %v910_v42 = vrot.slane %v714_v26, %v770_v51 }
  0x66   :  { %v272_v17 = vadd.f32 %v270_v18, %v248_v59  ;;  %v213_v18 = vsub.f32 %v201_v46, %v211_v3  ;;  %v247_v53 = vmul.f32 %v245_v47, %v774_v54  ;;  %v180_v59 = vadd.f32 %v178_v14, %v148_v6 }
  0x67   :  { %v218_v14 = vmul.f32 %v710_v24, %v735_v37  ;;  %v179_v24 = vmul.f32 %v797_v63, %v702_v20  ;;  %v254_v34 = vmul.f32 %v747_v41, %v774_v54  ;;  %v319_v20 = vmul.f32 %v900_v38, %v821_v29 }
  0x68   :  { %v284_v30 = vsub.f32 %v272_v17, %v282_v28  ;;  %v237_v5 = vadd.f32 %v235_v36, %v213_v18  ;;  %v143_v28 = vmul.f32 %v753_v43, %v681_v11  ;;  %v184_v3 = vadd.f32 %v182_v58, %v180_v59 }
  0x69   :  { %v250_v11 = vmul.f32 %v778_v55, %v755_v45  ;;  %v183_v55 = vmul.f32 %v762_v48, %v706_v23  ;;  %v215_v26 = vmul.f32 %v829_v44, %v723_v31  ;;  %v343_v41 = vmul.f32 %v910_v42, %v835_v49 }
  0x6a   :  { %v308_v22 = vadd.f32 %v306_v40, %v284_v30  ;;  %v249_v17 = vsub.f32 %v237_v5, %v247_v53  ;;  %v216_v40 = vadd.f32 %v214_v25, %v184_v3  ;;  %v145_v43 = vadd.f32 %v143_v28, %v113_v32 }
  0x6b   :  { %v353_v23 = vrot.slane %v716_v27, %v770_v51  ;;  %v322_v44 = vmul.f32 %v813_v4, %v799_v1  ;;  %v251_v33 = vmul.f32 %v245_v47, %v755_v45  ;;  %v358_v4 = vmul.f32 %v861_v62, %v835_v49 }
  0x6c   :  { %v320_v39 = vsub.f32 %v308_v22, %v318_v15  ;;  %v273_v36 = vadd.f32 %v271_v9, %v249_v17  ;;  %v220_v15 = vadd.f32 %v218_v14, %v216_v40  ;;  %v149_v6 = vadd.f32 %v147_v7, %v145_v43 }
  0x6d   :  { %v355_v25 = vmul.f32 %v353_v23, %v851_v0  ;;  %v287_v45 = vmul.f32 %v873_v52, %v780_v56  ;;  %v362_v14 = vmul.f32 %v817_v21, %v851_v0  ;;  %v291_v7 = vmul.f32 %v847_v10, %v786_v60 }
  0x6e   :  { %v344_v46 = vadd.f32 %v342_v35, %v320_v39  ;;  %v285_v30 = vsub.f32 %v273_v36, %v283_v8  ;;  %v252_v63 = vadd.f32 %v250_v11, %v220_v15  ;;  %v286_v35 = vmul.f32 %v790_v61, %v780_v56 }
  0x6f   :  { %v181_v18 = vadd.f32 %v179_v24, %v149_v6  ;;  %v219_v61 = vmul.f32 %v805_v16, %v735_v37  ;;  %v255_v37 = vmul.f32 %v841_v57, %v774_v54 }
  0x70   :  { %v356_v58 = vsub.f32 %v344_v46, %v354_v12  ;;  %v309_v53 = vadd.f32 %v307_v13, %v285_v30  ;;  %v256_v48 = vadd.f32 %v254_v34, %v252_v63  ;;  %v290_v12 = vmul.f32 %v768_v50, %v786_v60  ;;  %v991_v50 = vld [vmem:[#allocation18_spill] sm:$0xff] }
  0x71   :  { %v185_v9 = vadd.f32 %v183_v55, %v181_v18  ;;  %v326_v22 = vmul.f32 %v991_v50, %v821_v29 }
  0x72   :  { %366 = vst [vmem:[#allocation10] sm:$0xff] %v356_v58  ;;  %v321_v59 = vsub.f32 %v309_v53, %v319_v20  ;;  %v288_v31 = vadd.f32 %v286_v35, %v256_v48 }
  0x73   :  { %v217_v2 = vadd.f32 %v215_v26, %v185_v9 }
  0x74   :  { %v345_v27 = vadd.f32 %v343_v41, %v321_v59  ;;  %v292_v51 = vadd.f32 %v290_v12, %v288_v31 }
  0x75   :  { %v221_v5 = vadd.f32 %v219_v61, %v217_v2 }
  0x76   :  { %v357_v16 = vsub.f32 %v345_v27, %v355_v25  ;;  %v324_v28 = vadd.f32 %v322_v44, %v292_v51 }
  0x77   :  { %v253_v3 = vadd.f32 %v251_v33, %v221_v5 }
  0x78   :  { %367 = vst [vmem:[#allocation10 + $0x8] sm:$0xff] %v357_v16  ;;  %v328_v47 = vadd.f32 %v326_v22, %v324_v28 }
  0x79   :  { %v257_v32 = vadd.f32 %v255_v37, %v253_v3 }
  0x7a   :  { %512 = shalt.err (!%p509_p8)
}
  0x7b   :  { %s513_s20 = scalar_lea.hbm %s987_s4, 256 }
  0x7c   :  { %p514_p9 = scmp.ne.s32.totalorder %s987_s4, %s513_s20  ;;  %p517_p10 = scmp.lt.u32.totalorder %s513_s20, %s987_s4 }
  0x7e   :  { %p519_p11 = pnand %p517_p10, %p514_p9 }
  0x80   :  { %522 = shalt.err (!%p519_p11)
}
  0x81   :  { %381 = dma.vmem_to_hbm [thread:$0]  %s376_s1, 256, %s987_s4, [#allocation4], %s557_s30, %s557_s30, %s558_s6   ;;  %v360_v54 = vadd.f32 %v358_v4, %v328_v47  ;;  %v289_v56 = vadd.f32 %v287_v45, %v257_v32  ;;  %v323_v60 = vmul.f32 %v900_v38, %v799_v1  ;;  %v327_v57 = vmul.f32 %v888_v19, %v821_v29 }
  0x82   :  { %v359_v52 = vmul.f32 %v353_v23, %v835_v49  ;;  %v363_v17 = vmul.f32 %v910_v42, %v851_v0  ;;  %s562_s28 = smov [#allocation11]  }
  0x83   :  { %v364_v62 = vadd.f32 %v362_v14, %v360_v54  ;;  %v293_v21 = vadd.f32 %v291_v7, %v289_v56  ;;  %s387_s4 = sshll.u32 %s562_s28, 4  ;;  %s388_s4 = int_to_ptr.vmem [resolvable:$true] %s387_s4 }
  0x84   :  { %s523_s29 = scalar_lea.vmem %s388_s4, 256  ;;  %p528_p13 = scmp.lt.s32.totalorder %s388_s4, %s388_s4 }
  0x85   :  { %368 = vst [vmem:[#allocation11] sm:$0xff] %v364_v62  ;;  %v325_v10 = vadd.f32 %v323_v60, %v293_v21  ;;  %p524_p12 = scmp.ne.s32.totalorder %s388_s4, %s523_s29  ;;  %p529_p0 = scmp.lt.s32.totalorder %s523_s29, %s523_s29 }
  0x87   :  { %v329_v39 = vadd.f32 %v327_v57, %v325_v10  ;;  %p530_p1 = por %p529_p0, %p528_p13 }
  0x89   :  { %v361_v8 = vadd.f32 %v359_v52, %v329_v39  ;;  %p531_p2 = pnand %p530_p1, %p524_p12 }
  0x8b   :  { %v365_v40 = vadd.f32 %v363_v17, %v361_v8 }
  0x8d   :  { %369 = vst [vmem:[#allocation11 + $0x8] sm:$0xff] %v365_v40 }
  0x8e   :  { %534 = shalt.err (!%p531_p2)
}
  0x8f   :  { %s535_s7 = scalar_lea.hbm %s988_s5, 256 }
  0x90   :  { %p536_p3 = scmp.ne.s32.totalorder %s988_s5, %s535_s7  ;;  %p539_p4 = scmp.lt.u32.totalorder %s535_s7, %s988_s5 }
  0x92   :  { %p541_p5 = pnand %p539_p4, %p536_p3 }
  0x94   :  { %544 = shalt.err (!%p541_p5)
}
  0x95   :  { %393 = dma.vmem_to_hbm [thread:$0]  %s388_s4, 256, %s988_s5, [#allocation12], %s557_s30, %s557_s30, %s558_s6  }
  0x96   :  { %551 = dma.done.wait [#allocation4], 256  }
  0x97   :  { %552 = vsyncadd [#allocation4], 4294967040 }
  0x98   :  { %553 = dma.done.wait [#allocation12], 256  }
  0x99   :  { %554 = vsyncadd [#allocation12], 4294967040 }
  0x9a   :  { %400 = vsyncpa [#allocation3], 1 }
  0x9b   :  { %401 = vsyncpa [#allocation6], 1 }
  0x9c   :  { %402 = vsyncpa [#allocation9], 1 }
  0x9d   :  { %403 = vsyncpa [#allocation4], 1 }
  0x9e   :  { %404 = vsyncpa [#allocation12], 1 }

</bundles_post_ra>
